<compile_context>
chip_gen: v7x
topology: tpu7x:2x2x1
jax: 0.10.0
libtpu: 0.0.40
codegen_flags: <defaults>
</compile_context>

<pallas_src>
import math

import jax
import jax.numpy as jnp
from jax.experimental import pallas as pl
from jax.experimental.pallas import tpu as pltpu


def _round_up(x, m):
    return ((x + m - 1) // m) * m


def _actor_kernel(max_action):
    """Fused 3-layer MLP kernel: bf16 matmuls on the MXU, f32 epilogue."""

    def kernel(x_ref, w1_ref, b1_ref, w2_ref, b2_ref, w3_ref, b3_ref, o_ref):
        # Layer 1: (TB, S) @ (S, 256) + (1, 256), ReLU
        x = x_ref[...].astype(jnp.bfloat16)
        h = jnp.dot(x, w1_ref[...], preferred_element_type=jnp.float32)
        h = jnp.maximum(h + b1_ref[...], 0.0)

        # Layer 2: (TB, 256) @ (256, 256) + (1, 256), ReLU
        h = jnp.dot(h.astype(jnp.bfloat16), w2_ref[...],
                    preferred_element_type=jnp.float32)
        h = jnp.maximum(h + b2_ref[...], 0.0)

        # Layer 3: (TB, 256) @ (256, A_pad) + (1, A_pad), max_action * tanh
        h = jnp.dot(h.astype(jnp.bfloat16), w3_ref[...],
                    preferred_element_type=jnp.float32)
        h = h + b3_ref[...]
        o_ref[...] = (max_action * jnp.tanh(h)).astype(o_ref.dtype)

    return kernel


def actor_forward(state, params, max_action, *, batch_tile=256):
    """Run the Actor MLP as a batch-tiled fused Pallas kernel.

    state:  (B, state_dim) float32
    params: dict with w1 (S,256), b1 (1,256), w2 (256,256), b2 (1,256),
            w3 (256,A), b3 (1,A)  (float32; cast to bf16 here for the MXU)
    """
    # TODO(synk): max_action is baked in as a static Python float; route it
    # through SMEM if it ever needs to be a traced/varying value.
    B, S = state.shape
    hidden = params["w1"].shape[1]
    A = params["w3"].shape[1]

    # Lane-dense output: pad action_dim to a multiple of 128.
    A_pad = _round_up(max(A, 1), 128)
    # Batch tile: 256 fills the v6e/v7x MXU; cap for tiny batches (mult of 8).
    TB = min(batch_tile, _round_up(B, 8))
    B_pad = _round_up(B, TB)
    n_b = B_pad // TB

    state_p = state.astype(jnp.float32)
    if B_pad != B:
        state_p = jnp.pad(state_p, ((0, B_pad - B), (0, 0)))

    # bf16 weights (half the DMA bytes, native MXU rate); biases stay f32.
    w1 = params["w1"].astype(jnp.bfloat16)
    w2 = params["w2"].astype(jnp.bfloat16)
    w3 = params["w3"]
    b1 = params["b1"].astype(jnp.float32)
    b2 = params["b2"].astype(jnp.float32)
    b3 = params["b3"].astype(jnp.float32)
    if A_pad != A:
        w3 = jnp.pad(w3, ((0, 0), (0, A_pad - A)))
        b3 = jnp.pad(b3, ((0, 0), (0, A_pad - A)))
    w3 = w3.astype(jnp.bfloat16)

    # Tile only state and output over the batch; weights get constant
    # index_maps so they are fetched once and stay resident in VMEM.
    resident = lambda arr: pl.BlockSpec(arr.shape, lambda i: (0, 0))
    in_specs = [
        pl.BlockSpec((TB, S), lambda i: (i, 0)),   # state tile
        resident(w1), resident(b1),
        resident(w2), resident(b2),
        resident(w3), resident(b3),
    ]
    out_spec = pl.BlockSpec((TB, A_pad), lambda i: (i, 0))

    flops = 2 * B_pad * (S * hidden + hidden * hidden + hidden * A_pad)
    bytes_accessed = (
        state_p.size * 4
        + w1.size * 2 + w2.size * 2 + w3.size * 2
        + b1.size * 4 + b2.size * 4 + b3.size * 4
        + B_pad * A_pad * 4
    )
    cost = pl.CostEstimate(
        flops=flops,
        transcendentals=B_pad * A_pad,   # tanh
        bytes_accessed=bytes_accessed,
    )

    out = pl.pallas_call(
        _actor_kernel(float(max_action)),
        out_shape=jax.ShapeDtypeStruct((B_pad, A_pad), jnp.float32),
        grid=(n_b,),
        in_specs=in_specs,
        out_specs=out_spec,
        compiler_params=pltpu.CompilerParams(
            dimension_semantics=("parallel",),
            vmem_limit_bytes=8 << 20,
        ),
        cost_estimate=cost,
    )(state_p, w1, b1, w2, b2, w3, b3)

    return out[:B, :A]


def init_actor_params(key, state_dim, action_dim, hidden=256):
    """Deterministic PyTorch-Linear-style init: U(-1/sqrt(fan_in), 1/sqrt(fan_in))."""
    keys = jax.random.split(key, 6)

    def linear(kw, kb, fan_in, fan_out):
        bound = 1.0 / math.sqrt(fan_in)
        w = jax.random.uniform(kw, (fan_in, fan_out), jnp.float32, -bound, bound)
        b = jax.random.uniform(kb, (1, fan_out), jnp.float32, -bound, bound)
        return w, b

    w1, b1 = linear(keys[0], keys[1], state_dim, hidden)
    w2, b2 = linear(keys[2], keys[3], hidden, hidden)
    w3, b3 = linear(keys[4], keys[5], hidden, action_dim)
    return {"w1": w1, "b1": b1, "w2": w2, "b2": b2, "w3": w3, "b3": b3}


def actor_forward_ref(state, params, max_action):
    """Pure-JAX f32 reference for correctness checking."""
    h = jnp.maximum(state @ params["w1"] + params["b1"], 0.0)
    h = jnp.maximum(h @ params["w2"] + params["b2"], 0.0)
    return max_action * jnp.tanh(h @ params["w3"] + params["b3"])


if __name__ == "__main__":
    # Small, module-consistent shapes: batch=2, state_dim=16, action_dim=8.
    B, STATE_DIM, ACTION_DIM = 2, 16, 8
    MAX_ACTION = 2.0

    key = jax.random.PRNGKey(0)
    k_params, k_state, k_state2 = jax.random.split(key, 3)

    params = init_actor_params(k_params, STATE_DIM, ACTION_DIM)

    # Tiny-batch check (B=2).
    state = jax.random.normal(k_state, (B, STATE_DIM), jnp.float32)
    out = jax.block_until_ready(actor_forward(state, params, MAX_ACTION))
    ref = actor_forward_ref(state, params, MAX_ACTION)
    assert out.shape == (B, ACTION_DIM)
    # bf16 weights/activations in the matmuls -> loosened tolerance vs f32 ref.
    assert jnp.allclose(out, ref, atol=2e-2, rtol=2e-2), "mismatch vs reference (B=2)"

    # Multi-tile grid check (B=300 -> 2 batch tiles of 256 with padding).
    B2 = 300
    state2 = jax.random.normal(k_state2, (B2, STATE_DIM), jnp.float32)
    out2 = jax.block_until_ready(actor_forward(state2, params, MAX_ACTION))
    ref2 = actor_forward_ref(state2, params, MAX_ACTION)
    assert out2.shape == (B2, ACTION_DIM)
    assert jnp.allclose(out2, ref2, atol=2e-2, rtol=2e-2), "mismatch vs reference (B=300)"

    print("KERNEL_OK")
</pallas_src>

<mosaic_0001>
module attributes {stable_mosaic.version = 11 : i64} {
  func.func @kernel(%arg0: i32, %arg1: memref<8x16xf32, #tpu.memory_space<vmem>>, %arg2: memref<16x256xbf16, #tpu.memory_space<vmem>>, %arg3: memref<1x256xf32, #tpu.memory_space<vmem>>, %arg4: memref<256x256xbf16, #tpu.memory_space<vmem>>, %arg5: memref<1x256xf32, #tpu.memory_space<vmem>>, %arg6: memref<256x128xbf16, #tpu.memory_space<vmem>>, %arg7: memref<1x128xf32, #tpu.memory_space<vmem>>, %arg8: memref<8x128xf32, #tpu.memory_space<vmem>>) attributes {dimension_semantics = [#tpu.dimension_semantics<parallel>], iteration_bounds = array<i64: 1>, scalar_prefetch = 0 : i64, scratch_operands = 0 : i64, tpu.core_type = #tpu.core_type<tc>, window_params = [{transform_indices = @transform_0, window_bounds = array<i64: 8, 16>}, {pipeline_mode = #tpu.pipeline_mode<synchronous>, transform_indices = @transform_1, window_bounds = array<i64: 16, 256>}, {pipeline_mode = #tpu.pipeline_mode<synchronous>, transform_indices = @transform_2, window_bounds = array<i64: 1, 256>}, {pipeline_mode = #tpu.pipeline_mode<synchronous>, transform_indices = @transform_3, window_bounds = array<i64: 256, 256>}, {pipeline_mode = #tpu.pipeline_mode<synchronous>, transform_indices = @transform_4, window_bounds = array<i64: 1, 256>}, {pipeline_mode = #tpu.pipeline_mode<synchronous>, transform_indices = @transform_5, window_bounds = array<i64: 256, 128>}, {pipeline_mode = #tpu.pipeline_mode<synchronous>, transform_indices = @transform_6, window_bounds = array<i64: 1, 128>}, {transform_indices = @transform_7, window_bounds = array<i64: 8, 128>}]} {
    %c0 = arith.constant 0 : index
    %c0_0 = arith.constant 0 : index
    %0 = vector.load %arg1[%c0, %c0_0] : memref<8x16xf32, #tpu.memory_space<vmem>>, vector<8x16xf32>
    %1 = arith.truncf %0 : vector<8x16xf32> to vector<8x16xbf16>
    %c0_1 = arith.constant 0 : index
    %c0_2 = arith.constant 0 : index
    %2 = vector.load %arg2[%c0_1, %c0_2] : memref<16x256xbf16, #tpu.memory_space<vmem>>, vector<16x256xbf16>
    %cst = arith.constant dense<0.000000e+00> : vector<8x256xf32>
    %3 = tpu.matmul %1, %2, %cst {dimension_numbers = #tpu.dot_dimension_numbers<[1], [0], [0], [1], [0, 0, 1, 1], [], []>} : vector<8x16xbf16>, vector<16x256xbf16>, vector<8x256xf32> -> vector<8x256xf32>
    %c0_3 = arith.constant 0 : index
    %c0_4 = arith.constant 0 : index
    %4 = vector.load %arg3[%c0_3, %c0_4] : memref<1x256xf32, #tpu.memory_space<vmem>>, vector<1x256xf32>
    %5 = vector.broadcast %4 : vector<1x256xf32> to vector<8x256xf32>
    %6 = arith.addf %3, %5 : vector<8x256xf32>
    %cst_5 = arith.constant 0.000000e+00 : f32
    %7 = vector.broadcast %cst_5 : f32 to vector<8x256xf32>
    %8 = arith.maximumf %6, %7 : vector<8x256xf32>
    %9 = arith.truncf %8 : vector<8x256xf32> to vector<8x256xbf16>
    %c0_6 = arith.constant 0 : index
    %c0_7 = arith.constant 0 : index
    %10 = vector.load %arg4[%c0_6, %c0_7] : memref<256x256xbf16, #tpu.memory_space<vmem>>, vector<256x256xbf16>
    %cst_8 = arith.constant dense<0.000000e+00> : vector<8x256xf32>
    %11 = tpu.matmul %9, %10, %cst_8 {dimension_numbers = #tpu.dot_dimension_numbers<[1], [0], [0], [1], [0, 0, 1, 1], [], []>} : vector<8x256xbf16>, vector<256x256xbf16>, vector<8x256xf32> -> vector<8x256xf32>
    %c0_9 = arith.constant 0 : index
    %c0_10 = arith.constant 0 : index
    %12 = vector.load %arg5[%c0_9, %c0_10] : memref<1x256xf32, #tpu.memory_space<vmem>>, vector<1x256xf32>
    %13 = vector.broadcast %12 : vector<1x256xf32> to vector<8x256xf32>
    %14 = arith.addf %11, %13 : vector<8x256xf32>
    %cst_11 = arith.constant 0.000000e+00 : f32
    %15 = vector.broadcast %cst_11 : f32 to vector<8x256xf32>
    %16 = arith.maximumf %14, %15 : vector<8x256xf32>
    %17 = arith.truncf %16 : vector<8x256xf32> to vector<8x256xbf16>
    %c0_12 = arith.constant 0 : index
    %c0_13 = arith.constant 0 : index
    %18 = vector.load %arg6[%c0_12, %c0_13] : memref<256x128xbf16, #tpu.memory_space<vmem>>, vector<256x128xbf16>
    %cst_14 = arith.constant dense<0.000000e+00> : vector<8x128xf32>
    %19 = tpu.matmul %17, %18, %cst_14 {dimension_numbers = #tpu.dot_dimension_numbers<[1], [0], [0], [1], [0, 0, 1, 1], [], []>} : vector<8x256xbf16>, vector<256x128xbf16>, vector<8x128xf32> -> vector<8x128xf32>
    %c0_15 = arith.constant 0 : index
    %c0_16 = arith.constant 0 : index
    %20 = vector.load %arg7[%c0_15, %c0_16] : memref<1x128xf32, #tpu.memory_space<vmem>>, vector<1x128xf32>
    %21 = vector.broadcast %20 : vector<1x128xf32> to vector<8x128xf32>
    %22 = arith.addf %19, %21 : vector<8x128xf32>
    %23 = math.tanh %22 : vector<8x128xf32>
    %cst_17 = arith.constant 2.000000e+00 : f32
    %24 = vector.broadcast %cst_17 : f32 to vector<8x128xf32>
    %25 = arith.mulf %24, %23 : vector<8x128xf32>
    %c0_18 = arith.constant 0 : index
    %c0_19 = arith.constant 0 : index
    %26 = vector.load %arg8[%c0_18, %c0_19] : memref<8x128xf32, #tpu.memory_space<vmem>>, vector<8x128xf32>
    tpu.vector_store %arg8[%c0_18, %c0_19], %25 {strides = array<i32>} : memref<8x128xf32, #tpu.memory_space<vmem>>, vector<8x128xf32>,
    return
  }
  func.func @transform_0(%arg0: i32) -> (i32, i32) {
    %c0_i32 = arith.constant 0 : i32
    %c0_i32_0 = arith.constant 0 : i32
    return %arg0, %c0_i32 : i32, i32
  }
  func.func @transform_1(%arg0: i32) -> (i32, i32) {
    %c0_i32 = arith.constant 0 : i32
    %c0_i32_0 = arith.constant 0 : i32
    %c0_i32_1 = arith.constant 0 : i32
    return %c0_i32, %c0_i32_0 : i32, i32
  }
  func.func @transform_2(%arg0: i32) -> (i32, i32) {
    %c0_i32 = arith.constant 0 : i32
    %c0_i32_0 = arith.constant 0 : i32
    %c0_i32_1 = arith.constant 0 : i32
    return %c0_i32, %c0_i32_0 : i32, i32
  }
  func.func @transform_3(%arg0: i32) -> (i32, i32) {
    %c0_i32 = arith.constant 0 : i32
    %c0_i32_0 = arith.constant 0 : i32
    %c0_i32_1 = arith.constant 0 : i32
    return %c0_i32, %c0_i32_0 : i32, i32
  }
  func.func @transform_4(%arg0: i32) -> (i32, i32) {
    %c0_i32 = arith.constant 0 : i32
    %c0_i32_0 = arith.constant 0 : i32
    %c0_i32_1 = arith.constant 0 : i32
    return %c0_i32, %c0_i32_0 : i32, i32
  }
  func.func @transform_5(%arg0: i32) -> (i32, i32) {
    %c0_i32 = arith.constant 0 : i32
    %c0_i32_0 = arith.constant 0 : i32
    %c0_i32_1 = arith.constant 0 : i32
    return %c0_i32, %c0_i32_0 : i32, i32
  }
  func.func @transform_6(%arg0: i32) -> (i32, i32) {
    %c0_i32 = arith.constant 0 : i32
    %c0_i32_0 = arith.constant 0 : i32
    %c0_i32_1 = arith.constant 0 : i32
    return %c0_i32, %c0_i32_0 : i32, i32
  }
  func.func @transform_7(%arg0: i32) -> (i32, i32) {
    %c0_i32 = arith.constant 0 : i32
    %c0_i32_0 = arith.constant 0 : i32
    return %arg0, %c0_i32 : i32, i32
  }
}

</mosaic_0001>

<bundles_post_ra>
// kernel: tpu_custom_call.1
= control target key start
LH: loop header
LB: loop body
LE: loop exit
PB: predicated region body
PF: predicated region fallthrough
CT: control target
= control target key end

     0   :  { %12 = vsyncpa [#allocation3], 0  ;;  %s996_s0 = inlined_call_operand.hbm [shape: f32[8,16], index: 0, kind: input, shape index: {}]   ;;  %s997_s1 = inlined_call_operand.hbm [shape: bf16[16,256], index: 1, kind: input, shape index: {}]   ;;  %s998_s2 = inlined_call_operand.vmem [shape: f32[1,256], index: 2, kind: input, shape index: {}]   ;;  %s999_s3 = inlined_call_operand.hbm [shape: bf16[256,256], index: 3, kind: input, shape index: {}]   ;;  %s1000_s4 = inlined_call_operand.vmem [shape: f32[1,256], index: 4, kind: input, shape index: {}]   ;;  %s1001_s5 = inlined_call_operand.hbm [shape: bf16[256,128], index: 5, kind: input, shape index: {}]   ;;  %s1002_s6 = inlined_call_operand.vmem [shape: f32[1,128], index: 6, kind: input, shape index: {}]   ;;  %s1003_s7 = inlined_call_operand.hbm [shape: f32[8,128], index: 7, kind: output, shape index: {}]  }
   0x1   :  { %13 = vsyncpa [#allocation6], 0 }
   0x2   :  { %14 = vsyncpa [#allocation9], 0 }
   0x3   :  { %15 = vsyncpa [#allocation4], 0  ;;  %s871_s24 = smov [#allocation5]   ;;  %s753_s28 = scalar_lea.hbm %s997_s1, 256 }
   0x4   :  { %s31_s25 = sshll.u32 %s871_s24, 4  ;;  %p754_p0 = scmp.ne.s32.totalorder %s997_s1, %s753_s28  ;;  %s32_s25 = int_to_ptr.vmem [resolvable:$true] %s31_s25 }
   0x5   :  { %p757_p1 = scmp.lt.u32.totalorder %s753_s28, %s997_s1 }
   0x7   :  { %p759_p2 = pnand %p757_p1, %p754_p0 }
   0x9   :  { %762 = shalt.err (!%p759_p2)
}
   0xa   :  { %s763_s10 = scalar_lea.vmem %s32_s25, 256  ;;  %p768_p4 = scmp.lt.s32.totalorder %s32_s25, %s32_s25 }
   0xb   :  { %p764_p3 = scmp.ne.s32.totalorder %s32_s25, %s763_s10  ;;  %p769_p5 = scmp.lt.s32.totalorder %s763_s10, %s763_s10 }
   0xd   :  { %p770_p6 = por %p769_p5, %p768_p4 }
   0xf   :  { %p771_p7 = pnand %p770_p6, %p764_p3 }
  0x11   :  { %774 = shalt.err (!%p771_p7)
}
  0x12   :  { %s872_s11 = smov 128   ;;  %s873_s12 = smov 8  }
  0x13   :  { %37 = dma.hbm_to_vmem [thread:$0]  %s997_s1, 256, %s32_s25, [#allocation6], %s872_s11, %s872_s11, %s873_s12  }
  0x14   :  { %s874_s15 = smov [#allocation2]   ;;  %s875_s17 = smov [#allocation7]  }
  0x15   :  { %s22_s16 = sshll.u32 %s874_s15, 4  ;;  %s45_s18 = sshll.u32 %s875_s17, 4  ;;  %s23_s16 = int_to_ptr.vmem [resolvable:$true] %s22_s16  ;;  %s46_s18 = int_to_ptr.vmem [resolvable:$true] %s45_s18 }
  0x16   :  { %s775_s21 = scalar_lea.hbm %s996_s0, 128 }
  0x17   :  { %p776_p8 = scmp.ne.s32.totalorder %s996_s0, %s775_s21  ;;  %p779_p9 = scmp.lt.u32.totalorder %s775_s21, %s996_s0 }
  0x19   :  { %p781_p10 = pnand %p779_p9, %p776_p8 }
  0x1b   :  { %784 = shalt.err (!%p781_p10)
}
  0x1c   :  { %s785_s1 = scalar_lea.vmem %s23_s16, 128  ;;  %p790_p12 = scmp.lt.s32.totalorder %s23_s16, %s23_s16 }
  0x1d   :  { %p786_p11 = scmp.ne.s32.totalorder %s23_s16, %s785_s1  ;;  %p791_p13 = scmp.lt.s32.totalorder %s785_s1, %s785_s1 }
  0x1f   :  { %p792_p0 = por %p791_p13, %p790_p12 }
  0x21   :  { %p793_p1 = pnand %p792_p0, %p786_p11 }
  0x23   :  { %796 = shalt.err (!%p793_p1)
}
  0x24   :  { %25 = dma.hbm_to_vmem [thread:$0]  %s996_s0, 128, %s23_s16, [#allocation3]  }
  0x25   :  { %s797_s30 = scalar_lea.hbm %s999_s3, 4096 }
  0x26   :  { %p798_p2 = scmp.ne.s32.totalorder %s999_s3, %s797_s30  ;;  %p801_p3 = scmp.lt.u32.totalorder %s797_s30, %s999_s3 }
  0x28   :  { %p803_p4 = pnand %p801_p3, %p798_p2 }
  0x2a   :  { %806 = shalt.err (!%p803_p4)
}
  0x2b   :  { %s807_s14 = scalar_lea.vmem %s46_s18, 4096  ;;  %p812_p6 = scmp.lt.s32.totalorder %s46_s18, %s46_s18 }
  0x2c   :  { %p808_p5 = scmp.ne.s32.totalorder %s46_s18, %s807_s14  ;;  %p813_p7 = scmp.lt.s32.totalorder %s807_s14, %s807_s14 }
  0x2e   :  { %p814_p8 = por %p813_p7, %p812_p6 }
  0x30   :  { %p815_p9 = pnand %p814_p8, %p808_p5 }
  0x32   :  { %818 = shalt.err (!%p815_p9)
}
  0x33   :  { %51 = dma.hbm_to_vmem [thread:$0]  %s999_s3, 4096, %s46_s18, [#allocation6], %s872_s11, %s872_s11, %s873_s12  }
  0x34   :  { %s876_s16 = smov [#allocation8]   ;;  %s819_s21 = scalar_lea.hbm %s1001_s5, 2048 }
  0x35   :  { %s59_s17 = sshll.u32 %s876_s16, 4  ;;  %p820_p10 = scmp.ne.s32.totalorder %s1001_s5, %s819_s21  ;;  %s60_s17 = int_to_ptr.vmem [resolvable:$true] %s59_s17 }
  0x36   :  { %p823_p11 = scmp.lt.u32.totalorder %s819_s21, %s1001_s5 }
  0x38   :  { %p825_p12 = pnand %p823_p11, %p820_p10 }
  0x3a   :  { %828 = shalt.err (!%p825_p12)
}
  0x3b   :  { %s829_s1 = scalar_lea.vmem %s60_s17, 2048  ;;  %p834_p0 = scmp.lt.s32.totalorder %s60_s17, %s60_s17 }
  0x3c   :  { %p830_p13 = scmp.ne.s32.totalorder %s60_s17, %s829_s1  ;;  %p835_p1 = scmp.lt.s32.totalorder %s829_s1, %s829_s1 }
  0x3e   :  { %p836_p2 = por %p835_p1, %p834_p0 }
  0x40   :  { %p837_p3 = pnand %p836_p2, %p830_p13 }
  0x42   :  { %840 = shalt.err (!%p837_p3)
}
  0x43   :  { %s877_s3 = smov 64   ;;  %s878_s11 = smov 4  }
  0x44   :  { %65 = dma.hbm_to_vmem [thread:$0]  %s1001_s5, 2048, %s60_s17, [#allocation9], %s877_s3, %s877_s3, %s878_s11  }
  0x45   :  { %863 = dma.done.wait [#allocation3], 128  }
  0x46   :  { %864 = vsyncadd [#allocation3], 4294967168 }
  0x47   :  { %865 = dma.done.wait [#allocation6], 4352  }
  0x48   :  { %866 = vsyncadd [#allocation6], 4294962944 }
  0x49   :  { %867 = dma.done.wait [#allocation9], 2048  }
  0x4a   :  { %868 = vsyncadd [#allocation9], 4294965248  ;;  %v879_v0 = vmov 0   ;;  %v684_v1 = vld [vmem:[#allocation5 + $0x4] ss:$8 sps:$4 sm:$0xff]   ;;  %v81_v3 = vld [vmem:[#allocation2] sm:$0xff]  ;;  %v87_v49 = vlaneseq }
  0x4b   :  { %143 = vmatprep.mubr.bf16.mxu0 %v879_v0  ;;  %v686_v2 = vld [vmem:[#allocation5] ss:$8 sps:$4 sm:$0xff]   ;;  %111 = vmatprep.subr.bf16.mxu0 %v684_v1  ;;  %v82_v4 = vpack.c.bf16 %v81_v3, %v81_v3  ;;  %v687_v5 = vld [vmem:[#allocation7 + $0x4] ss:$8 sps:$4 sm:$0xff]   ;;  %v689_v6 = vld [vmem:[#allocation7] ss:$8 sps:$4 sm:$0xff]  }
  0x4c   :  { %112 = vmatpush1.bf16.msra.mxu0 %v686_v2  ;;  %vm107_vm0 = vcmask 130048   ;;  %v690_v7 = vld [vmem:[#allocation7 + $0x14] ss:$8 sps:$4 sm:$0xff]   ;;  %360 = vmatprep.subr.bf16.mxu1 %v687_v5  ;;  %v692_v8 = vld [vmem:[#allocation7 + $0x10] ss:$8 sps:$4 sm:$0xff]   ;;  %v735_v37 = vld [vmem:[#allocation8 + $0x40] sm:$0xff]  }
  0x4d   :  { %361 = vmatpush1.bf16.msra.mxu1 %v689_v6  ;;  %v693_v9 = vld [vmem:[#allocation7 + $0x24] ss:$8 sps:$4 sm:$0xff]   ;;  %v695_v10 = vld [vmem:[#allocation7 + $0x20] ss:$8 sps:$4 sm:$0xff]   ;;  %v696_v11 = vld [vmem:[#allocation7 + $0x34] ss:$8 sps:$4 sm:$0xff]   ;;  %652 = vmatprep.subr.bf16.mxu0 %v735_v37 }
  0x4e   :  { %362 = vmatprep.subr.bf16.mxu1 %v690_v7  ;;  %v698_v12 = vld [vmem:[#allocation7 + $0x30] ss:$8 sps:$4 sm:$0xff]   ;;  %v699_v13 = vld [vmem:[#allocation7 + $0x44] ss:$8 sps:$4 sm:$0xff]   ;;  %v701_v14 = vld [vmem:[#allocation7 + $0x40] ss:$8 sps:$4 sm:$0xff]  }
  0x4f   :  { %602 = vmatmul.mubr.msk.bf16.vlgmr.msra.gmra.mrb[0].mxu0 %vm107_vm0, %v82_v4  ;;  %v702_v15 = vld [vmem:[#allocation7 + $0x54] ss:$8 sps:$4 sm:$0xff]   ;;  %v704_v16 = vld [vmem:[#allocation7 + $0x50] ss:$8 sps:$4 sm:$0xff]   ;;  %v705_v17 = vld [vmem:[#allocation7 + $0x64] ss:$8 sps:$4 sm:$0xff]  }
  0x50   :  { %v707_v18 = vld [vmem:[#allocation7 + $0x60] ss:$8 sps:$4 sm:$0xff]   ;;  %v708_v19 = vld [vmem:[#allocation7 + $0x74] ss:$8 sps:$4 sm:$0xff]   ;;  %v710_v20 = vld [vmem:[#allocation7 + $0x70] ss:$8 sps:$4 sm:$0xff]  }
  0x51   :  { %363 = vmatpush1.bf16.msra.mxu1 %v692_v8  ;;  %v711_v21 = vld [vmem:[#allocation7 + $0x84] ss:$8 sps:$4 sm:$0xff]   ;;  %v713_v22 = vld [vmem:[#allocation7 + $0x80] ss:$8 sps:$4 sm:$0xff]   ;;  %v714_v23 = vld [vmem:[#allocation7 + $0x94] ss:$8 sps:$4 sm:$0xff]  }
  0x52   :  { %364 = vmatprep.subr.bf16.mxu1 %v693_v9  ;;  %v716_v24 = vld [vmem:[#allocation7 + $0x90] ss:$8 sps:$4 sm:$0xff]   ;;  %v717_v25 = vld [vmem:[#allocation7 + $0xa4] ss:$8 sps:$4 sm:$0xff]   ;;  %v719_v26 = vld [vmem:[#allocation7 + $0xa0] ss:$8 sps:$4 sm:$0xff]  }
  0x53   :  { %v720_v27 = vld [vmem:[#allocation7 + $0xb4] ss:$8 sps:$4 sm:$0xff]   ;;  %v722_v28 = vld [vmem:[#allocation7 + $0xb0] ss:$8 sps:$4 sm:$0xff]   ;;  %v723_v29 = vld [vmem:[#allocation7 + $0xc4] ss:$8 sps:$4 sm:$0xff]  }
  0x54   :  { %v725_v30 = vld [vmem:[#allocation7 + $0xc0] ss:$8 sps:$4 sm:$0xff]   ;;  %v726_v31 = vld [vmem:[#allocation7 + $0xd4] ss:$8 sps:$4 sm:$0xff]   ;;  %v728_v32 = vld [vmem:[#allocation7 + $0xd0] ss:$8 sps:$4 sm:$0xff]  }
  0x55   :  { %365 = vmatpush1.bf16.msra.mxu1 %v695_v10  ;;  %v729_v33 = vld [vmem:[#allocation7 + $0xe4] ss:$8 sps:$4 sm:$0xff]   ;;  %v731_v34 = vld [vmem:[#allocation7 + $0xe0] ss:$8 sps:$4 sm:$0xff]   ;;  %v732_v35 = vld [vmem:[#allocation7 + $0xf4] ss:$8 sps:$4 sm:$0xff]  }
  0x56   :  { %366 = vmatprep.subr.bf16.mxu1 %v696_v11  ;;  %v734_v36 = vld [vmem:[#allocation7 + $0xf0] ss:$8 sps:$4 sm:$0xff]   ;;  %v736_v38 = vld [vmem:[#allocation8] sm:$0xff]   ;;  %v737_v39 = vld [vmem:[#allocation8 + $0x48] sm:$0xff]   ;;  %v88_v50 = vshrl.u32 %v87_v49, 7 }
  0x57   :  { %653 = vmatpush3.bf16.msra.mxu0 %v736_v38  ;;  %v738_v40 = vld [vmem:[#allocation8 + $0x8] sm:$0xff]   ;;  %v739_v41 = vld [vmem:[#allocation8 + $0x50] sm:$0xff]   ;;  %v741_v43 = vld [vmem:[#allocation8 + $0x58] sm:$0xff]  }
  0x58   :  { %654 = vmatprep.subr.bf16.mxu0 %v737_v39  ;;  %v740_v42 = vld [vmem:[#allocation8 + $0x10] sm:$0xff]   ;;  %v742_v44 = vld [vmem:[#allocation8 + $0x18] sm:$0xff]   ;;  %v743_v45 = vld [vmem:[#allocation8 + $0x60] sm:$0xff]   ;;  %v89_v51 = vsub.s32 0, %v88_v50  ;;  %v93_v53 = vsub.s32 1, %v88_v50 }
  0x59   :  { %367 = vmatpush1.bf16.msra.mxu1 %v698_v12  ;;  %v744_v46 = vld [vmem:[#allocation8 + $0x20] sm:$0xff]   ;;  %v745_v47 = vld [vmem:[#allocation8 + $0x68] sm:$0xff]   ;;  %v747_v2 = vld [vmem:[#allocation8 + $0x70] sm:$0xff]  }
  0x5a   :  { %368 = vmatprep.subr.bf16.mxu1 %v699_v13  ;;  %v746_v48 = vld [vmem:[#allocation8 + $0x28] sm:$0xff]   ;;  %v748_v3 = vld [vmem:[#allocation8 + $0x30] sm:$0xff]   ;;  %v749_v4 = vld [vmem:[#allocation8 + $0x78] sm:$0xff]  }
  0x5b   :  { %655 = vmatpush3.bf16.msra.mxu0 %v738_v40  ;;  %v85_v52 = vld [vmem:[%s998_s2] sm:$0x3]  ;;  %v750_v5 = vld [vmem:[#allocation8 + $0x38] sm:$0xff]  }
  0x5c   :  { %656 = vmatprep.subr.bf16.mxu0 %v739_v41  ;;  %v90_v54 = vrot.slane %v85_v52, %v89_v51  ;;  %v94_v55 = vrot.slane %v85_v52, %v93_v53  ;;  %v188_v6 = vld [vmem:[%s1000_s4] sm:$0x3]  ;;  %s880_s4 = smov [#allocation10]  }
  0x5d   :  { %369 = vmatpush1.bf16.msra.mxu1 %v701_v14  ;;  %v193_v7 = vrot.slane %v188_v6, %v89_v51  ;;  %v197_v8 = vrot.slane %v188_v6, %v93_v53  ;;  %s589_s30 = sshll.u32 %s880_s4, 4  ;;  %s590_s30 = int_to_ptr.vmem [resolvable:$true] %s589_s30 }
  0x5e   :  { %370 = vmatprep.subr.bf16.mxu1 %v702_v15  ;;  %s841_s8 = scalar_lea.vmem %s590_s30, 128  ;;  %p846_p5 = scmp.lt.s32.totalorder %s590_s30, %s590_s30 }
  0x5f   :  { %657 = vmatpush3.bf16.msra.mxu0 %v740_v42  ;;  %p842_p4 = scmp.ne.s32.totalorder %s590_s30, %s841_s8  ;;  %p847_p6 = scmp.lt.s32.totalorder %s841_s8, %s841_s8 }
  0x60   :  { %658 = vmatprep.subr.bf16.mxu0 %v741_v43 }
  0x61   :  { %371 = vmatpush1.bf16.msra.mxu1 %v704_v16  ;;  %p848_p7 = por %p847_p6, %p846_p5 }
  0x62   :  { %372 = vmatprep.subr.bf16.mxu1 %v705_v17 }
  0x63   :  { %659 = vmatpush3.bf16.msra.mxu0 %v742_v44  ;;  %p849_p8 = pnand %p848_p7, %p842_p4 }
  0x64   :  { %660 = vmatprep.subr.bf16.mxu0 %v743_v45 }
  0x65   :  { %373 = vmatpush1.bf16.msra.mxu1 %v707_v18 }
  0x66   :  { %374 = vmatprep.subr.bf16.mxu1 %v708_v19 }
  0x67   :  { %661 = vmatpush3.bf16.msra.mxu0 %v744_v46 }
  0x68   :  { %662 = vmatprep.subr.bf16.mxu0 %v745_v47 }
  0x69   :  { %375 = vmatpush1.bf16.msra.mxu1 %v710_v20  ;;  %v635_v20 = vld [vmem:[%s1002_s6] ss:$0 sm:$0xff] }
  0x6a   :  { %376 = vmatprep.subr.bf16.mxu1 %v711_v21 }
  0x6b   :  { %663 = vmatpush3.bf16.msra.mxu0 %v746_v48 }
  0x6c   :  { %664 = vmatprep.subr.bf16.mxu0 %v747_v2 }
  0x6d   :  { %377 = vmatpush1.bf16.msra.mxu1 %v713_v22 }
  0x6e   :  { %378 = vmatprep.subr.bf16.mxu1 %v714_v23 }
  0x6f   :  { %665 = vmatpush3.bf16.msra.mxu0 %v748_v3 }
  0x70   :  { %666 = vmatprep.subr.bf16.mxu0 %v749_v4 }
  0x71   :  { %379 = vmatpush1.bf16.msra.mxu1 %v716_v24 }
  0x72   :  { %380 = vmatprep.subr.bf16.mxu1 %v717_v25 }
  0x73   :  { %667 = vmatpush3.bf16.msra.mxu0 %v750_v5 }
  0x75   :  { %381 = vmatpush1.bf16.msra.mxu1 %v719_v26 }
  0x76   :  { %382 = vmatprep.subr.bf16.mxu1 %v720_v27 }
  0x79   :  { %383 = vmatpush1.bf16.msra.mxu1 %v722_v28 }
  0x7a   :  { %384 = vmatprep.subr.bf16.mxu1 %v723_v29 }
  0x7d   :  { %385 = vmatpush1.bf16.msra.mxu1 %v725_v30 }
  0x7e   :  { %386 = vmatprep.subr.bf16.mxu1 %v726_v31 }
  0x81   :  { %387 = vmatpush1.bf16.msra.mxu1 %v728_v32 }
  0x82   :  { %388 = vmatprep.subr.bf16.mxu1 %v729_v33 }
  0x85   :  { %389 = vmatpush1.bf16.msra.mxu1 %v731_v34 }
  0x86   :  { %390 = vmatprep.subr.bf16.mxu1 %v732_v35 }
  0x89   :  { %391 = vmatpush1.bf16.msra.mxu1 %v734_v36 }
 0x122   :  { %v145_v56 = vpop.f32.mrb[0].mxu0 }
 0x123   :  { %v146_v57 = vadd.f32 %v145_v56, %v90_v54  ;;  %v147_v58 = vpop.f32.mrb[1].mxu0 }
 0x124   :  { %v148_v59 = vadd.f32 %v147_v58, %v94_v55  ;;  %v149_v60 = vpop.f32.mrb[2].mxu0 }
 0x125   :  { %v152_v61 = vmax.f32 %v146_v57, 0.0  ;;  %v150_v62 = vpop.f32.mrb[3].mxu0 }
 0x126   :  { %v153_v63 = vmax.f32 %v148_v59, 0.0 }
 0x127   :  { %v154_v1 = vpack.c.bf16 %v152_v61, %v152_v61 }
 0x128   :  { %v155_v0 = vpack.c.bf16 %v153_v63, %v153_v63 }
 0x12a   :  { %392 = vmatprep.mubr.bf16.mxu1 %v155_v0 }
 0x12b   :  { %393 = vmatmul.mubr.bf16.vlgmr.msra.gmra.mrb[0].mxu1 %v154_v1 }
 0x1fe   :  { %v394_v9 = vpop.f32.mrb[0].mxu1 }
 0x1ff   :  { %v395_v10 = vadd.f32 %v394_v9, %v193_v7  ;;  %v396_v11 = vpop.f32.mrb[1].mxu1 }
 0x200   :  { %v397_v12 = vadd.f32 %v396_v11, %v197_v8  ;;  %v398_v13 = vpop.f32.mrb[2].mxu1 }
 0x201   :  { %v401_v14 = vmax.f32 %v395_v10, 0.0  ;;  %v399_v15 = vpop.f32.mrb[3].mxu1 }
 0x202   :  { %v402_v16 = vmax.f32 %v397_v12, 0.0 }
 0x203   :  { %v403_v18 = vpack.c.bf16 %v401_v14, %v401_v14 }
 0x204   :  { %v404_v17 = vpack.c.bf16 %v402_v16, %v402_v16 }
 0x206   :  { %572 = vmatprep.mubr.bf16.mxu0 %v404_v17 }
 0x207   :  { %573 = vmatmul.mubr.bf16.vlgmr.msra.gmra.mrb[4].mxu0 %v403_v18 }
 0x2da   :  { %v668_v19 = vpop.f32.mrb[4].mxu0 }
 0x2db   :  { %v669_v21 = vpop.f32.mrb[5].mxu0 }
 0x2dc   :  { %v670_v22 = vadd.f32 %v669_v21, %v668_v19  ;;  %v671_v23 = vpop.f32.mrb[6].mxu0 }
 0x2dd   :  { %v672_v24 = vpop.f32.mrb[7].mxu0 }
 0x2de   :  { %v575_v25 = vadd.f32 %v670_v22, %v635_v20 }
 0x2e0   :  { %751 = vtanh.f32 %v575_v25 }
 0x2ea   :  { %v752_v26 = vpop.eup %751 }
 0x2eb   :  { %v581_v27 = vmul.f32 2.0, %v752_v26 }
 0x2ed   :  { %582 = vst [vmem:[#allocation10] sm:$0xff] %v581_v27 }
 0x2ee   :  { %852 = shalt.err (!%p849_p8)
}
 0x2ef   :  { %s853_s10 = scalar_lea.hbm %s1003_s7, 128 }
 0x2f0   :  { %p854_p9 = scmp.ne.s32.totalorder %s1003_s7, %s853_s10  ;;  %p857_p10 = scmp.lt.u32.totalorder %s853_s10, %s1003_s7 }
 0x2f2   :  { %p859_p11 = pnand %p857_p10, %p854_p9 }
 0x2f4   :  { %862 = shalt.err (!%p859_p11)
}
 0x2f5   :  { %592 = dma.vmem_to_hbm [thread:$0]  %s590_s30, 128, %s1003_s7, [#allocation4]  }
 0x2f6   :  { %869 = dma.done.wait [#allocation4], 128  }
 0x2f7   :  { %870 = vsyncadd [#allocation4], 4294967168 }
 0x2f8   :  { %596 = vsyncpa [#allocation3], 1 }
 0x2f9   :  { %597 = vsyncpa [#allocation6], 1 }
 0x2fa   :  { %598 = vsyncpa [#allocation9], 1 }
 0x2fb   :  { %599 = vsyncpa [#allocation4], 1 }

</bundles_post_ra>
